<compile_context>
chip_gen: v7x
topology: tpu7x:2x2x1
jax: 0.10.0
libtpu: 0.0.40
codegen_flags: <defaults>
</compile_context>

<pallas_src>
import functools

import jax
import jax.numpy as jnp
from jax.experimental import pallas as pl
from jax.experimental.pallas import tpu as pltpu

LANE = 128


def _treenode_kernel(x_ref, wt_ref, b_ref, o_ref, *, compute_dtype):
    """For each image i in the block:
       o[i, c_out, hw] = sum_cin wT[c_out, c_in] * x[i, c_in, hw] + b[c_out]  (f32 acc)."""
    w = wt_ref[...]                       # (C_out, C_in), already compute dtype
    b = b_ref[...]                        # (C_out, 1), f32
    nb = x_ref.shape[0]                   # static batch-block size
    for i in range(nb):                   # static unroll over images in the block
        xi = x_ref[i]                     # (C_in, tile_hw), native dtype (e.g. f32)
        if compute_dtype is not None:
            xi = xi.astype(compute_dtype)  # in-kernel VPU cast; no extra HBM traffic
        y = jnp.dot(w, xi, preferred_element_type=jnp.float32)
        o_ref[i] = (y + b).astype(o_ref.dtype)


def treenode_forward(x_nchw, w0, b0, w1, b1, *, tile_hw_max=8192,
                     batch_block_max=8, compute_dtype=jnp.bfloat16,
                     out_dtype=None):
    """x_nchw: (N, C_in, H, W); w*: (C_in, C_out); b*: (C_out,) -> (N, C_out, H, W).

    compute_dtype=None keeps the dot in the input dtype (strict f32 parity).
    out_dtype defaults to x.dtype (set to bf16 to cut store-stream HBM traffic;
    note that is a semantic change for downstream consumers)."""
    N, C_in, H, W = x_nchw.shape
    C_out = w0.shape[1]
    HW = H * W
    out_dtype = x_nchw.dtype if out_dtype is None else out_dtype

    # Fold both 1x1-conv edges (split='copy', merge='add', use_avg=True):
    #   (x@W0+b0 + x@W1+b1)/2 == x @ (W0+W1)/2 + (b0+b1)/2
    w_dtype = x_nchw.dtype if compute_dtype is None else compute_dtype
    wt = jnp.transpose(0.5 * (w0 + w1)).astype(w_dtype)          # (C_out, C_in), tiny
    b2 = (0.5 * (b0 + b1)).reshape(C_out, 1).astype(jnp.float32)  # broadcast over lanes

    # NCHW-direct view: free reshape, no transpose, no dtype cast, no padding.
    x_flat = x_nchw.reshape(N, C_in, HW)

    # Spatial tile: full HW when it fits (equals the full dim -> always legal),
    # otherwise a 128-multiple tile; partial boundary blocks rely on Pallas
    # store masking (safe here: each output column depends only on the same
    # input column -- do not add cross-column reductions without re-masking).
    if HW <= tile_hw_max:
        tile_hw = HW
    else:
        tile_hw = max(LANE, (tile_hw_max // LANE) * LANE)
    n_hw_tiles = pl.cdiv(HW, tile_hw)

    # Batch blocking: enlarge per-step bytes when HW is small, but keep at
    # least 2 grid steps where possible so v7x's two TensorCores both get work.
    nb = min(N, batch_block_max)
    if n_hw_tiles == 1 and N >= 2:
        nb = min(nb, max(1, N // 2))
    n_batch_tiles = pl.cdiv(N, nb)
    grid = (n_batch_tiles, n_hw_tiles)

    itemsize = lambda dt: jnp.dtype(dt).itemsize
    cost = pl.CostEstimate(
        flops=2 * N * HW * C_in * C_out,
        transcendentals=0,
        bytes_accessed=(N * C_in * HW * itemsize(x_nchw.dtype)
                        + N * C_out * HW * itemsize(out_dtype)
                        + C_out * C_in * itemsize(wt.dtype)
                        + C_out * 4),
    )

    kernel = functools.partial(_treenode_kernel, compute_dtype=compute_dtype)
    out = pl.pallas_call(
        kernel,
        out_shape=jax.ShapeDtypeStruct((N, C_out, HW), out_dtype),
        grid_spec=pltpu.PrefetchScalarGridSpec(
            num_scalar_prefetch=0,
            grid=grid,
            in_specs=[
                # x block: nb images, full channels, lane-dense spatial tile
                pl.BlockSpec((nb, C_in, tile_hw), lambda n, t: (n, 0, t)),
                # fused transposed weight, resident across the whole grid
                pl.BlockSpec((C_out, C_in), lambda n, t: (0, 0)),
                # fused bias (C_out, 1), resident
                pl.BlockSpec((C_out, 1), lambda n, t: (0, 0)),
            ],
            out_specs=pl.BlockSpec((nb, C_out, tile_hw), lambda n, t: (n, 0, t)),
        ),
        compiler_params=pltpu.CompilerParams(
            dimension_semantics=("parallel", "parallel"),
        ),
        cost_estimate=cost,
    )(x_flat, wt, b2)

    return out.reshape(N, C_out, H, W)


def treenode_reference_f32(x, w0, b0, w1, b1):
    """Pure-f32 reference of the original TreeNode forward (PyTorch semantics)."""
    N, C_in, H, W = x.shape
    C_out = w0.shape[1]
    xf = jnp.transpose(x, (0, 2, 3, 1)).reshape(-1, C_in)
    y = (xf @ w0 + b0[None, :] + xf @ w1 + b1[None, :]) * 0.5
    return jnp.transpose(y.reshape(N, H, W, C_out), (0, 3, 1, 2))


def treenode_reference_matched(x, w0, b0, w1, b1, compute_dtype):
    """Reference mirroring the kernel's dtype handling (bf16 dot, f32 acc)."""
    N, C_in, H, W = x.shape
    C_out = w0.shape[1]
    wt = jnp.transpose(0.5 * (w0 + w1)).astype(compute_dtype)        # (C_out, C_in)
    bf = (0.5 * (b0 + b1)).reshape(1, C_out, 1).astype(jnp.float32)
    xf = x.reshape(N, C_in, H * W).astype(compute_dtype)
    y = jnp.einsum("oc,nch->noh", wt, xf,
                   preferred_element_type=jnp.float32) + bf
    return y.astype(x.dtype).reshape(N, C_out, H, W)


if __name__ == "__main__":
    key = jax.random.PRNGKey(0)
    k_x, k_w0, k_b0, k_w1, k_b1 = jax.random.split(key, 5)

    # Small shapes: batch=2, in_channels=4, out_channels=8, spatial=16x16
    N, C_in, C_out, H, W = 2, 4, 8, 16, 16

    x = jax.random.normal(k_x, (N, C_in, H, W), dtype=jnp.float32)
    # Deterministic synthetic weights for the two 1x1-conv edges (stored (C_in, C_out)).
    w0 = jax.random.normal(k_w0, (C_in, C_out), dtype=jnp.float32) * 0.1
    b0 = jax.random.normal(k_b0, (C_out,), dtype=jnp.float32) * 0.01
    w1 = jax.random.normal(k_w1, (C_in, C_out), dtype=jnp.float32) * 0.1
    b1 = jax.random.normal(k_b1, (C_out,), dtype=jnp.float32) * 0.01

    # Default path (bf16 compute, f32 out): grid (2, 1) -> >=2 parallel steps.
    out = jax.block_until_ready(treenode_forward(x, w0, b0, w1, b1))
    assert out.shape == (N, C_out, H, W)

    ref_m = treenode_reference_matched(x, w0, b0, w1, b1, jnp.bfloat16)
    assert jnp.allclose(out, ref_m, atol=1e-4, rtol=1e-4)

    ref_f32 = treenode_reference_f32(x, w0, b0, w1, b1)
    assert jnp.allclose(out, ref_f32, atol=3e-2, rtol=3e-2)

    # Strict f32-parity path (no bf16 anywhere).
    out_f32 = jax.block_until_ready(
        treenode_forward(x, w0, b0, w1, b1, compute_dtype=None))
    assert jnp.allclose(out_f32, ref_f32, atol=1e-5, rtol=1e-5)

    # Exercise the multi-spatial-tile + batch-blocked (nb=2) kernel path.
    out_blk = jax.block_until_ready(
        treenode_forward(x, w0, b0, w1, b1, tile_hw_max=128, batch_block_max=2))
    assert jnp.allclose(out_blk, ref_m, atol=1e-4, rtol=1e-4)

    # TODO(synk): path_drop / cell_drop stochastic training branches, recursive
    # child_nodes, virtual_forward BN-statistics accumulation, and the graph
    # transformation methods are host-side control flow / training-only paths;
    # only the inference leaf path (drop rates 0, child_nodes=[None, None]) is
    # implemented in-kernel.
    print("KERNEL_OK")
</pallas_src>

<mosaic_0001>
module attributes {stable_mosaic.version = 11 : i64} {
  func.func @_treenode_kernel(%arg0: i32, %arg1: i32, %arg2: memref<1x4x256xf32, #tpu.memory_space<vmem>>, %arg3: memref<8x4xbf16, #tpu.memory_space<vmem>>, %arg4: memref<8x1xf32, #tpu.memory_space<vmem>>, %arg5: memref<1x8x256xf32, #tpu.memory_space<vmem>>) attributes {dimension_semantics = [#tpu.dimension_semantics<parallel>, #tpu.dimension_semantics<parallel>], iteration_bounds = array<i64: 2, 1>, scalar_prefetch = 0 : i64, scratch_operands = 0 : i64, tpu.core_type = #tpu.core_type<tc>, window_params = [{transform_indices = @transform_0, window_bounds = array<i64: 1, 4, 256>}, {pipeline_mode = #tpu.pipeline_mode<synchronous>, transform_indices = @transform_1, window_bounds = array<i64: 8, 4>}, {pipeline_mode = #tpu.pipeline_mode<synchronous>, transform_indices = @transform_2, window_bounds = array<i64: 8, 1>}, {transform_indices = @transform_3, window_bounds = array<i64: 1, 8, 256>}]} {
    %c0 = arith.constant 0 : index
    %c0_0 = arith.constant 0 : index
    %0 = vector.load %arg3[%c0, %c0_0] : memref<8x4xbf16, #tpu.memory_space<vmem>>, vector<8x4xbf16>
    %c0_1 = arith.constant 0 : index
    %c0_2 = arith.constant 0 : index
    %1 = vector.load %arg4[%c0_1, %c0_2] : memref<8x1xf32, #tpu.memory_space<vmem>>, vector<8x1xf32>
    %c0_3 = arith.constant 0 : index
    %c0_4 = arith.constant 0 : index
    %c0_5 = arith.constant 0 : index
    %2 = vector.load %arg2[%c0_3, %c0_4, %c0_5] : memref<1x4x256xf32, #tpu.memory_space<vmem>>, vector<1x4x256xf32>
    %3 = vector.shape_cast %2 : vector<1x4x256xf32> to vector<4x256xf32>
    %4 = arith.truncf %3 : vector<4x256xf32> to vector<4x256xbf16>
    %cst = arith.constant dense<0.000000e+00> : vector<8x256xf32>
    %5 = tpu.matmul %0, %4, %cst {dimension_numbers = #tpu.dot_dimension_numbers<[1], [0], [0], [1], [0, 0, 1, 1], [], []>} : vector<8x4xbf16>, vector<4x256xbf16>, vector<8x256xf32> -> vector<8x256xf32>
    %6 = vector.broadcast %1 : vector<8x1xf32> to vector<8x256xf32>
    %7 = arith.addf %5, %6 : vector<8x256xf32>
    %c0_6 = arith.constant 0 : index
    %c0_7 = arith.constant 0 : index
    %c0_8 = arith.constant 0 : index
    %8 = vector.load %arg5[%c0_6, %c0_7, %c0_8] : memref<1x8x256xf32, #tpu.memory_space<vmem>>, vector<1x8x256xf32>
    %9 = vector.shape_cast %8 : vector<1x8x256xf32> to vector<8x256xf32>
    %10 = vector.shape_cast %7 : vector<8x256xf32> to vector<1x8x256xf32>
    tpu.vector_store %arg5[%c0_6, %c0_7, %c0_8], %10 {strides = array<i32>} : memref<1x8x256xf32, #tpu.memory_space<vmem>>, vector<1x8x256xf32>,
    return
  }
  func.func @transform_0(%arg0: i32, %arg1: i32) -> (i32, i32, i32) {
    %c0_i32 = arith.constant 0 : i32
    %c0_i32_0 = arith.constant 0 : i32
    return %arg0, %c0_i32, %arg1 : i32, i32, i32
  }
  func.func @transform_1(%arg0: i32, %arg1: i32) -> (i32, i32) {
    %c0_i32 = arith.constant 0 : i32
    %c0_i32_0 = arith.constant 0 : i32
    %c0_i32_1 = arith.constant 0 : i32
    return %c0_i32, %c0_i32_0 : i32, i32
  }
  func.func @transform_2(%arg0: i32, %arg1: i32) -> (i32, i32) {
    %c0_i32 = arith.constant 0 : i32
    %c0_i32_0 = arith.constant 0 : i32
    %c0_i32_1 = arith.constant 0 : i32
    return %c0_i32, %c0_i32_0 : i32, i32
  }
  func.func @transform_3(%arg0: i32, %arg1: i32) -> (i32, i32, i32) {
    %c0_i32 = arith.constant 0 : i32
    %c0_i32_0 = arith.constant 0 : i32
    return %arg0, %c0_i32, %arg1 : i32, i32, i32
  }
}

</mosaic_0001>

<bundles_post_ra>
// kernel: tpu_custom_call.1
= control target key start
LH: loop header
LB: loop body
LE: loop exit
PB: predicated region body
PF: predicated region fallthrough
CT: control target
= control target key end

     0   :  { %8 = vsyncpa [#allocation3], 0  ;;  %s776_s0 = inlined_call_operand.hbm [shape: f32[2,4,256], index: 0, kind: input, shape index: {}]   ;;  %s777_s1 = inlined_call_operand.vmem [shape: bf16[8,4], index: 1, kind: input, shape index: {}]   ;;  %s778_s2 = inlined_call_operand.vmem [shape: f32[8,1], index: 2, kind: input, shape index: {}]   ;;  %s779_s3 = inlined_call_operand.hbm [shape: f32[2,8,256], index: 3, kind: output, shape index: {}]  }
   0x1   :  { %10 = vsyncpa [#allocation3 + $0x1], 0 }
   0x2   :  { %11 = vsyncpa [#allocation4], 0 }
   0x3   :  { %13 = vsyncpa [#allocation4 + $0x1], 0  ;;  %s597_s12 = smov 0   ;;  %s599_s13 = smov 0  }
   0x4   :  { %s601_s14 = smov 0   ;;  %s603_s15 = smov 0  }
   0x5   :  { %s605_s16 = smov 0   ;;  %s607_s17 = smov 0  }
   0x6 LB: > { %s376_s18 = sadd.s32 4294967295, %s572_s17   ;;  %s377_s19 = sadd.s32 4294967294, %s572_s17   ;;  %s572_s17 = sphi %s607_s17, %s19_s17   ;;  %s568_s16 = sphi %s605_s16, %s795_s16   ;;  %s564_s15 = sphi %s603_s15, %s794_s15   ;;  %s560_s14 = sphi %s601_s14, %s793_s14   ;;  %s556_s13 = sphi %s599_s13, %s792_s13   ;;  %s552_s12 = sphi %s597_s12, %s791_s12  }
   0x7   : > { %s31_s20 = sadd.s32 1, %s568_s16  ;;  %s40_s21 = sadd.s32 1, %s560_s14 }
   0x8   : > { %p33_p0 = scmp.ge.s32.totalorder %s31_s20, 2  ;;  %p47_p1 = scmp.ne.s32.totalorder %s560_s14, %s556_s13 }
   0x9   : > { %p48_p2 = scmp.eq.s32.totalorder %s572_s17, 0  ;;  %p53_p3 = scmp.ne.s32.totalorder %s556_s13, %s552_s12 }
   0xa   : > { %s797_s20 = smov (%p33_p0, %s31_s20), 0  ;;  %p54_p5 = scmp.eq.s32.totalorder %s376_s18, 0 }
   0xb   : > { %p638_p4 = por %p48_p2, %p47_p1  ;;  %s35_s23 = ssub.s32 %s568_s16, %s797_s20 }
   0xc   : > { %p121_p6 = scmp.eq.s32.totalorder %s376_s18, 1  ;;  %p38_p7 = scmp.eq.s32.totalorder %s35_s23, 0 }
   0xd   : > { %p644_p8 = por %p54_p5, %p53_p3  ;;  %p127_p10 = scmp.eq.s32.totalorder %s377_s19, 1 }
   0xe   : > { %p648_p9 = por %p121_p6, %p47_p1  ;;  %p407_p13 = scmp.lt.s32.totalorder %s572_s17, 2 }
   0xf   : > { %s653_s26 = scalar_select %p38_p7, %s560_s14, %s40_s21  }
  0x10   : > { %s783_s25 = scalar_select %p648_p9, 1, 0 }
  0x11   : > { %p655_p11 = por %p127_p10, %p53_p3  ;;  %s153_s28 = sand.u32 1, %s560_s14  }
  0x12   : > { %s380_s29 = sshll.u32 %s153_s28, 3  ;;  %s393_s30 = sshll.u32 %s568_s16, 7 }
  0x13   : > { %s784_s27 = scalar_select %p655_p11, 1, 0 }
  0x14   : > { %s666_s6 = scalar_lea.hbm %s776_s0, %s393_s30  ;;  %s157_s7 = scalar_lea.vmem [#allocation2], %s380_s29 }
  0x15   : > { %s167_s8 = sshll.u32 %s157_s7, 4  ;;  %p672_p0 = pnand %p407_p13, %p638_p4  ;;  %s668_s8 = int_to_ptr.vmem [resolvable:$true] %s167_s8 }
  0x16   : > { %s154_s10 = scalar_lea.sflag [#allocation3], %s153_s28  ;;  %s460_s11 = scalar_lea.hbm %s666_s6, 128 }
  0x17   : > { %p461_p3 = scmp.ne.s32.totalorder %s666_s6, %s460_s11  ;;  %p462_p5 = pneg %p672_p0 }
  0x18   : > { %s465_s21 = scalar_lea.hbm %s776_s0, 256  ;;  %p466_p4 = scmp.lt.u32.totalorder %s666_s6, %s776_s0 }
  0x19   : > { %p463_p6 = pnand %p462_p5, %p461_p3  ;;  %p467_p10 = scmp.lt.u32.totalorder %s465_s21, %s460_s11 }
  0x1a   : > { %p469_p12 = scmp.lt.u32.totalorder %s460_s11, %s666_s6 }
  0x1b   : > { %p464_p7 = pneg %p463_p6  ;;  %p468_p13 = por %p467_p10, %p466_p4 }
  0x1d   : > { %p470_p1 = por %p469_p12, %p468_p13 }
  0x1f   : > { %p471_p2 = pnand %p470_p1, %p464_p7 }
  0x21   : > { %474 = shalt.err (!%p471_p2)
}
  0x22   : > { %s475_s28 = scalar_lea.vmem %s668_s8, 128  ;;  %s574_s29 = smov [#allocation2]  }
  0x23   : > { %p476_p3 = scmp.ne.s32.totalorder %s668_s8, %s475_s28  ;;  %s480_s30 = sshll.u32 %s574_s29, 4  ;;  %s481_s30 = int_to_ptr.vmem [resolvable:$false] %s480_s30 }
  0x24   : > { %s482_s4 = scalar_lea.vmem %s481_s30, 256  ;;  %p483_p9 = scmp.lt.s32.totalorder %s668_s8, %s481_s30 }
  0x25   : > { %p478_p6 = pnand %p476_p3, %p462_p5  ;;  %p484_p4 = scmp.lt.s32.totalorder %s482_s4, %s475_s28 }
  0x27   : > { %p479_p11 = pneg %p478_p6  ;;  %p485_p10 = por %p484_p4, %p483_p9 }
  0x29   : > { %p486_p12 = pnand %p485_p10, %p479_p11 }
  0x2b   : > { %489 = shalt.err (!%p486_p12)
}
  0x2c   : > { %402 = dma.hbm_to_vmem [thread:$0]  (!%p672_p0), %s666_s6, 128, %s668_s8, %s154_s10  }
  0x2d   : > { %p786_p1 = scmp.lt.s32.totalorder %s572_s17, 3  ;;  %p787_p2 = scmp.ge.s32.totalorder %s572_s17, 1 }
  0x2f   : > { %p173_p5 = pnand %p787_p2, %p786_p1 }
  0x30   : > { %s708_s5 = sand.u32 (!%p173_p5), 1, %s556_s13  }
  0x31   : > { %176 = sbr.rel (%p173_p5) target bundleno = 295 (0x127), region = 32  ;;  %s384_s7 = sshll.u32 (!%p173_p5), %s708_s5, 3 }
  0x32   : > { %s179_s11 = scalar_lea.sflag (!%p173_p5), [#allocation3], %s708_s5  ;;  %s182_s18 = scalar_lea.vmem (!%p173_p5), [#allocation2], %s384_s7 }
  0x38   : > { %543 = dma.done.wait (%p644_p8), %s179_s11, 128  }
  0x39   : > { %545 = vsyncadd (%p644_p8), %s179_s11, 4294967168  ;;  %v575_v0 = vmov 0   ;;  %v210_v1 = vld [vmem:[%s182_s18] sm:$0xff]  ;;  %vm225_vm0 = vcmask 1041408   ;;  %vm221_vm1 = vcmask 31744   ;;  %s385_s10 = sshll.u32 %s708_s5, 4 }
  0x3a   : > { %264 = vmatprep.mubr.bf16.mxu0 %v575_v0  ;;  %458 = vset.pattern.permute.xlu0 %v575_v0  ;;  %v209_v2 = vld [vmem:[%s778_s2] sm:$0xff]  ;;  %v212_v3 = vcombine.high %v210_v1, %v210_v1  ;;  %v214_v4 = vpack.c.bf16 %v210_v1, %v210_v1  ;;  %s394_s19 = sshll.u32 %s564_s15, 8  ;;  %s204_s21 = scalar_lea.vmem [#allocation5], %s385_s10 }
  0x3b   : > { %218 = vperm.xlu0 %458, %v209_v2   ;;  %v208_v7 = vld [vmem:[%s777_s1] sm:$0xf]  ;;  %s292_s22 = sshll.u32 %s204_s21, 4  ;;  %s727_s29 = scalar_lea.hbm %s779_s3, %s394_s19  ;;  %s729_s22 = int_to_ptr.vmem [resolvable:$true] %s292_s22 }
  0x3c   : > { %v215_v5 = vpack.c.bf16 %v212_v3, %v212_v3  ;;  %v227_v6 = vsel %vm225_vm0, %v214_v4, 0  ;;  %s276_s15 = scalar_lea.sflag [#allocation4], %s708_s5  ;;  %s490_s30 = scalar_lea.vmem %s729_s22, 256 }
  0x3d   : > { %p491_p8 = scmp.ne.s32.totalorder %s729_s22, %s490_s30  ;;  %p788_p9 = scmp.ne.s32.totalorder %s783_s25, 0 }
  0x3e   : > { %386 = vmatprep.subr.msk.bf16.mxu0 %vm225_vm0, %v215_v5  ;;  %s576_s4 = smov [#allocation5]  }
  0x3f   : > { %233 = vmatpush1.bf16.msra.mxu0 %v227_v6  ;;  %p492_p11 = pnand %p491_p8, %p788_p9  ;;  %s494_s7 = sshll.u32 %s576_s4, 4  ;;  %s495_s7 = int_to_ptr.vmem [resolvable:$false] %s494_s7 }
  0x40   : > { %s496_s11 = scalar_lea.vmem %s495_s7, 512  ;;  %p497_p7 = scmp.lt.s32.totalorder %s729_s22, %s495_s7 }
  0x41   : > { %p493_p0 = pneg %p492_p11  ;;  %p498_p13 = scmp.lt.s32.totalorder %s496_s11, %s490_s30 }
  0x42   : > { %387 = vmatmul.mubr.msk.bf16.vlgmr.msra.gmra.mrb[0].mxu0 %vm221_vm1, %v208_v7 }
  0x43   : > { %p499_p3 = por %p498_p13, %p497_p7 }
  0x45   : > { %p500_p6 = pnand %p499_p3, %p493_p0 }
  0xba   : > { %v219_v8 = vpop.permute.xlu0 %218 }
 0x115   : > { %v266_v9 = vpop.f32.mrb[0].mxu0 }
 0x116   : > { %v267_v10 = vadd.f32 %v266_v9, %v219_v8  ;;  %v268_v11 = vpop.f32.mrb[1].mxu0 }
 0x117   : > { %v269_v12 = vadd.f32 %v268_v11, %v219_v8  ;;  %v270_v13 = vpop.f32.mrb[2].mxu0 }
 0x118   : > { %273 = vst [vmem:[%s204_s21] sm:$0xff] %v267_v10  ;;  %v271_v14 = vpop.f32.mrb[3].mxu0 }
 0x119   : > { %274 = vst [vmem:[%s204_s21 + $0x8] sm:$0xff] %v269_v12 }
 0x11a   : > { %503 = shalt.err (!%p500_p6)
}
 0x11b   : > { %s504_s5 = scalar_lea.hbm %s727_s29, 256  ;;  %s508_s8 = scalar_lea.hbm %s779_s3, 512 }
 0x11c   : > { %p505_p4 = scmp.ne.s32.totalorder %s727_s29, %s504_s5  ;;  %p509_p1 = scmp.lt.u32.totalorder %s727_s29, %s779_s3 }
 0x11d   : > { %p510_p2 = scmp.lt.u32.totalorder %s508_s8, %s504_s5  ;;  %p512_p8 = scmp.lt.u32.totalorder %s504_s5, %s727_s29 }
 0x11e   : > { %p506_p10 = pnand %p505_p4, %p788_p9 }
 0x11f   : > { %p511_p5 = por %p510_p2, %p509_p1 }
 0x120   : > { %p507_p12 = pneg %p506_p10 }
 0x121   : > { %p513_p11 = por %p512_p8, %p511_p5 }
 0x123   : > { %p514_p0 = pnand %p513_p11, %p507_p12 }
 0x125   : > { %517 = shalt.err (!%p514_p0)
}
 0x126   : > { %397 = dma.vmem_to_hbm [thread:$0]  (%p788_p9), %s729_s22, 256, %s727_s29, %s276_s15  }
 0x127 PF: > { %s304_s10 = sand.u32 1, %s552_s12   ;;  %p789_p7 = scmp.ne.s32.totalorder %s784_s27, 0 }
 0x128   : > { %p790_p13 = scmp.ge.s32.totalorder %s572_s17, 2  ;;  %s305_s19 = scalar_lea.sflag [#allocation4], %s304_s10 }
 0x12a   : > { %p404_p3 = pnand %p790_p13, %p789_p7 }
 0x12c   : > { %547 = dma.done.wait (!%p404_p3), %s305_s19, 256  }
 0x12d   : > { %549 = vsyncadd (!%p404_p3), %s305_s19, 4294967040  ;;  %s19_s17 = sadd.s32 1, %s572_s17   ;;  %s791_s12 = smov %s556_s13 }
 0x12e   : > { %p16_p6 = scmp.ge.s32.totalorder %s19_s17, 4   ;;  %s792_s13 = smov %s560_s14 }
 0x12f   : > { %s793_s14 = smov %s653_s26  ;;  %s794_s15 = smov %s568_s16 }
 0x130   : > { %s795_s16 = smov %s797_s20  ;;  %18 = sbr.rel (!%p16_p6) target bundleno = 6 (0x6), region = 77 }
 0x137   :  { %310 = vsyncpa [#allocation3], 1 }
 0x138   :  { %312 = vsyncpa [#allocation3 + $0x1], 1 }
 0x139   :  { %313 = vsyncpa [#allocation4], 1 }
 0x13a   :  { %315 = vsyncpa [#allocation4 + $0x1], 1 }

</bundles_post_ra>
